<compile_context>
chip_gen: v5e
topology: v5e:2x2
jax: 0.10.0
libtpu: 0.0.40
codegen_flags: <defaults>
</compile_context>

<pallas_src>
import functools

import jax
import jax.numpy as jnp
from jax.experimental import pallas as pl
from jax.experimental.pallas import tpu as pltpu

_LANES = 128                     # vreg lane width
_SUBLANES = 8                    # f32 sublane count
_MIB = 1024 * 1024
_NUM_CORE_SHARDS = 2             # pass-1 reduction shards (the 2 TCs on v7x)
_UNALIGNED_SMALL_MAX = 16 * 1024  # elems handled by the (1, n) single-block path


def _cdiv(a, b):
    return -(-a // b)


def _round_up(a, b):
    return ((a + b - 1) // b) * b


def _vmem_limit_bytes():
    """~3/4 of physical VMEM: 96 MiB on v5e/v6e (128 MiB), 48 MiB on v7x (64 MiB)."""
    cap = 64 * _MIB  # conservative default (v7x physical)
    try:
        info = pltpu.get_tpu_info()
        for name in ("vmem_capacity_bytes", "vmem_size_bytes", "vmem_bytes"):
            val = getattr(info, name, None)
            if val:
                cap = int(val)
                break
    except Exception:
        pass
    return max(32 * _MIB, (3 * cap) // 4)


# ----------------------------------------------------------------------------
# Kernels
# ----------------------------------------------------------------------------
def _single_block_kernel(x_ref, o_ref, *, count):
    """Fast path: whole array resident in one block -> sum + subtract in one pass."""
    x = x_ref[...].astype(jnp.float32)
    mu = jnp.sum(x) / count
    o_ref[...] = (x - mu).astype(o_ref.dtype)


def _partial_sum_kernel(x_ref, psum_ref, *, tile_rows, tiles_per_shard, total_rows,
                        need_mask):
    """Pass 1: per-shard (1,128) f32 per-lane partial sums, resident across the
    'arbitrary' reduction axis."""
    @pl.when(pl.program_id(1) == 0)
    def _init():
        psum_ref[...] = jnp.zeros_like(psum_ref)

    x = x_ref[...].astype(jnp.float32)
    if need_mask:
        # Global tile index (may exceed the real tile count for phantom tiles on
        # the last shard, or point at a ragged last tile): zero the invalid rows.
        g = pl.program_id(0) * tiles_per_shard + pl.program_id(1)
        start = g * tile_rows
        valid = jnp.clip(total_rows - start, 0, tile_rows)
        row_ids = jax.lax.broadcasted_iota(jnp.int32, x.shape, 0)
        x = jnp.where(row_ids < valid, x, 0.0)
    psum_ref[...] += jnp.sum(x, axis=0, keepdims=True)


def _subtract_mean_kernel(mean_ref, x_ref, o_ref):
    """Pass 2: o = x - mean, mean is a single f32 scalar in SMEM."""
    mu = mean_ref[0]
    o_ref[...] = (x_ref[...].astype(jnp.float32) - mu).astype(o_ref.dtype)


# ----------------------------------------------------------------------------
# Two-pass tiled path
# ----------------------------------------------------------------------------
def _centered_two_pass(x2d, n_true, orig_dtype, vmem_limit, max_tile_rows):
    rows = x2d.shape[0]
    itemsize = jnp.dtype(orig_dtype).itemsize

    # Fixed large tile (multiple of 8, >= 8, <= max_tile_rows); never shrinks to
    # satisfy divisibility -- the cdiv grid + in-kernel mask handles the tail.
    tile_rows = min(max(_SUBLANES, (max_tile_rows // _SUBLANES) * _SUBLANES),
                    _round_up(rows, _SUBLANES))
    num_tiles = _cdiv(rows, tile_rows)
    tiles_per_shard = _cdiv(num_tiles, _NUM_CORE_SHARDS)
    need_mask = (rows % tile_rows != 0) or (num_tiles % _NUM_CORE_SHARDS != 0)

    def x_map_p1(c, i):
        # Clamp phantom tiles onto the last real tile; the kernel masks them to 0.
        return (jnp.minimum(c * tiles_per_shard + i, num_tiles - 1), 0)

    # Pass 1: global f32 sum, sharded over a leading "parallel" axis (both TCs
    # on v7x), accumulated along the trailing "arbitrary" axis.
    partials = pl.pallas_call(
        functools.partial(_partial_sum_kernel, tile_rows=tile_rows,
                          tiles_per_shard=tiles_per_shard, total_rows=rows,
                          need_mask=need_mask),
        out_shape=jax.ShapeDtypeStruct((1, _NUM_CORE_SHARDS * _LANES), jnp.float32),
        grid=(_NUM_CORE_SHARDS, tiles_per_shard),
        in_specs=[pl.BlockSpec((tile_rows, _LANES), x_map_p1)],
        out_specs=pl.BlockSpec((1, _LANES), lambda c, i: (0, c)),
        compiler_params=pltpu.CompilerParams(
            dimension_semantics=("parallel", "arbitrary"),
            vmem_limit_bytes=vmem_limit),
        cost_estimate=pl.CostEstimate(
            flops=rows * _LANES, transcendentals=0,
            bytes_accessed=rows * _LANES * itemsize),
    )(x2d)

    # Tiny wrapper-side reduce of the per-shard per-lane partials; pre-fold 1/N
    # so pass 2 receives the mean directly as an SMEM scalar.
    mean = (jnp.sum(partials) / n_true).astype(jnp.float32).reshape(1)

    # Pass 2: o = x - mean over lane-dense tiles ("parallel" -> both TCs on v7x).
    out2d = pl.pallas_call(
        _subtract_mean_kernel,
        out_shape=jax.ShapeDtypeStruct((rows, _LANES), orig_dtype),
        grid=(num_tiles,),
        in_specs=[pl.BlockSpec(memory_space=pltpu.MemorySpace.SMEM),
                  pl.BlockSpec((tile_rows, _LANES), lambda i: (i, 0))],
        out_specs=pl.BlockSpec((tile_rows, _LANES), lambda i: (i, 0)),
        compiler_params=pltpu.CompilerParams(
            dimension_semantics=("parallel",),
            vmem_limit_bytes=vmem_limit),
        cost_estimate=pl.CostEstimate(
            flops=2 * rows * _LANES, transcendentals=0,
            bytes_accessed=2 * rows * _LANES * itemsize),
    )(mean, x2d)
    return out2d


# ----------------------------------------------------------------------------
# Public wrapper
# ----------------------------------------------------------------------------
def centered_layer(x, *, max_tile_rows=8192, force_two_pass=False):
    """X - X.mean() over all elements (global scalar mean), torch semantics."""
    orig_shape = x.shape
    orig_dtype = x.dtype
    n = int(x.size)
    if n == 0:
        return x

    vmem_limit = _vmem_limit_bytes()
    x_flat = x.reshape(-1)

    if n % _LANES == 0:
        rows = n // _LANES
        x2d = x_flat.reshape(rows, _LANES)        # free view: no pad, no copy
        # Single-block fast path: ~2N bytes HBM traffic vs ~3N for two-pass.
        # Budget ~5x the f32-equivalent size (in/out blocks + f32 temps).
        small_ok = (5 * n * 4) <= vmem_limit
        if small_ok and not force_two_pass:
            out2d = pl.pallas_call(
                functools.partial(_single_block_kernel, count=float(n)),
                out_shape=jax.ShapeDtypeStruct((rows, _LANES), orig_dtype),
                in_specs=[pl.BlockSpec((rows, _LANES), lambda: (0, 0))],
                out_specs=pl.BlockSpec((rows, _LANES), lambda: (0, 0)),
                compiler_params=pltpu.CompilerParams(vmem_limit_bytes=vmem_limit),
            )(x2d)
        else:
            out2d = _centered_two_pass(x2d, n, orig_dtype, vmem_limit, max_tile_rows)
        return out2d.reshape(orig_shape)

    # n is not a multiple of 128.
    if n <= _UNALIGNED_SMALL_MAX and not force_two_pass:
        # Whole array as one (1, n) block: a full-dims block sidesteps the (8,128)
        # divisibility rule and avoids any wrapper-side pad/slice copies.
        x2d = x_flat.reshape(1, n)
        out2d = pl.pallas_call(
            functools.partial(_single_block_kernel, count=float(n)),
            out_shape=jax.ShapeDtypeStruct((1, n), orig_dtype),
            in_specs=[pl.BlockSpec((1, n), lambda: (0, 0))],
            out_specs=pl.BlockSpec((1, n), lambda: (0, 0)),
            compiler_params=pltpu.CompilerParams(vmem_limit_bytes=vmem_limit),
        )(x2d)
        return out2d.reshape(orig_shape)

    # Large AND not a multiple of 128: pad to a lane multiple (copy), run the
    # tiled path (zero padding doesn't bias the sum; we divide by the true n),
    # then slice the pad off.
    # TODO(synk): replace with in-kernel ragged-lane masking over 1-D blocks to
    # drop this pad/slice copy for huge non-128-multiple inputs.
    n_pad = _round_up(n, _LANES)
    x2d = jnp.pad(x_flat, (0, n_pad - n)).reshape(n_pad // _LANES, _LANES)
    out2d = _centered_two_pass(x2d, n, orig_dtype, vmem_limit, max_tile_rows)
    return out2d.reshape(-1)[:n].reshape(orig_shape)


if __name__ == "__main__":
    key = jax.random.PRNGKey(0)
    k1, k2, k3, k4 = jax.random.split(key, 4)

    # 1) Small NCHW input: lane-aligned single-block fast path ((16,128) view).
    x1 = jax.random.normal(k1, (2, 4, 16, 16), dtype=jnp.float32)
    y1 = centered_layer(x1)
    jax.block_until_ready(y1)
    ref1 = x1 - jnp.mean(x1)
    assert y1.shape == x1.shape and y1.dtype == x1.dtype
    assert jnp.allclose(y1, ref1, atol=1e-6, rtol=1e-6)
    assert jnp.abs(jnp.mean(y1)) < 1e-5

    # 2) The spec's own shape (1, 1, 6, 8): 48 elems, unaligned -> (1,48) block,
    #    no pad/slice copies.
    x2 = jax.random.normal(k2, (1, 1, 6, 8), dtype=jnp.float32)
    y2 = centered_layer(x2)
    jax.block_until_ready(y2)
    ref2 = x2 - jnp.mean(x2)
    assert y2.shape == x2.shape and y2.dtype == x2.dtype
    assert jnp.allclose(y2, ref2, atol=1e-6, rtol=1e-6)

    # 3) Force the tiled two-pass path (multi-step cdiv grid, core-sharded pass 1).
    y3 = centered_layer(x1, force_two_pass=True, max_tile_rows=8)
    jax.block_until_ready(y3)
    assert jnp.allclose(y3, ref1, atol=1e-6, rtol=1e-6)

    # 4) Tiled path with a ragged last tile (rows=15, tile_rows=8): exercises the
    #    in-kernel row mask and the masked partial output writeback.
    x4 = jax.random.normal(k4, (3, 5, 128), dtype=jnp.float32)
    y4 = centered_layer(x4, force_two_pass=True, max_tile_rows=8)
    jax.block_until_ready(y4)
    ref4 = x4 - jnp.mean(x4)
    assert jnp.allclose(y4, ref4, atol=1e-6, rtol=1e-6)

    # 5) bf16 input: reduction accumulates in f32, output cast back to bf16.
    x5 = jax.random.normal(k3, (2, 4, 16, 16), dtype=jnp.bfloat16)
    y5 = centered_layer(x5)
    jax.block_until_ready(y5)
    ref5 = (x5.astype(jnp.float32) - jnp.mean(x5.astype(jnp.float32))).astype(jnp.bfloat16)
    assert y5.dtype == jnp.bfloat16
    assert jnp.allclose(y5.astype(jnp.float32), ref5.astype(jnp.float32), atol=5e-2)

    print("KERNEL_OK")
</pallas_src>

<mosaic_0001>
module attributes {stable_mosaic.version = 11 : i64} {
  func.func @_single_block_kernel(%arg0: memref<16x128xf32, #tpu.memory_space<vmem>>, %arg1: memref<16x128xf32, #tpu.memory_space<vmem>>) attributes {dimension_semantics = [], scalar_prefetch = 0 : i64, scratch_operands = 0 : i64, tpu.core_type = #tpu.core_type<tc>} {
    %c0 = arith.constant 0 : index
    %c0_0 = arith.constant 0 : index
    %0 = vector.load %arg0[%c0, %c0_0] : memref<16x128xf32, #tpu.memory_space<vmem>>, vector<16x128xf32>
    %1 = vector.shape_cast %0 : vector<16x128xf32> to vector<1x16x128xf32>
    %cst = arith.constant dense<0.000000e+00> : vector<1xf32>
    %2 = vector.multi_reduction <add>, %1, %cst [1, 2] : vector<1x16x128xf32> to vector<1xf32>
    %3 = vector.shape_cast %2 : vector<1xf32> to vector<1x1x1xf32>
    %4 = vector.extract %3[0, 0, 0] : f32 from vector<1x1x1xf32>
    %cst_1 = arith.constant 2.048000e+03 : f32
    %5 = arith.divf %4, %cst_1 : f32
    %6 = vector.broadcast %5 : f32 to vector<16x128xf32>
    %7 = arith.subf %0, %6 : vector<16x128xf32>
    %c0_2 = arith.constant 0 : index
    %c0_3 = arith.constant 0 : index
    %8 = vector.load %arg1[%c0_2, %c0_3] : memref<16x128xf32, #tpu.memory_space<vmem>>, vector<16x128xf32>
    tpu.vector_store %arg1[%c0_2, %c0_3], %7 {strides = array<i32>} : memref<16x128xf32, #tpu.memory_space<vmem>>, vector<16x128xf32>,
    return
  }
}

</mosaic_0001>

<bundles_post_ra>
// kernel: tpu_custom_call.1
= control target key start
LH: loop header
LB: loop body
LE: loop exit
PB: predicated region body
PF: predicated region fallthrough
CT: control target
= control target key end

     0   :  { %6 = vsyncpa [#allocation3], 0  ;;  %s160_s0 = inlined_call_operand.hbm [shape: f32[16,128], index: 0, kind: input, shape index: {}]   ;;  %s161_s1 = inlined_call_operand.hbm [shape: f32[16,128], index: 1, kind: output, shape index: {}]  }
   0x1   :  { %7 = vsyncpa [#allocation4], 0  ;;  %s12_s8 = sshll.u32 %s160_s0, 4  ;;  %s133_s9 = smov [#allocation2]   ;;  %s13_s8 = int_to_ptr.hbm [resolvable:$true] %s12_s8 }
   0x2   :  { %s14_s10 = sshll.u32 %s133_s9, 4  ;;  %s134_s11 = smov 128   ;;  %s15_s10 = int_to_ptr.vmem [resolvable:$true] %s14_s10 }
   0x3   :  { %s135_s12 = smov 8  }
   0x4   :  { %20 = dma.hbm_to_vmem [thread:$0]  %s13_s8, 256, %s15_s10, [#allocation3], %s134_s11, %s134_s11, %s135_s12  }
   0x5   :  { %129 = dma.done.wait [#allocation3], 256  }
   0x6   :  { %130 = vsyncadd [#allocation3], 4294967040  ;;  %v25_v0 = vld [vmem:[#allocation2] sm:$0xff]  ;;  %v26_v1 = vld [vmem:[#allocation2 + $0x8] sm:$0xff]  ;;  %v136_v3 = vmov 2048.0   ;;  %s137_s15 = smov [#allocation5]  }
   0x7   :  { %v27_v2 = vadd.f32 %v26_v1, %v25_v0  ;;  %79 = vrcp.f32 %v136_v3  ;;  %s55_s16 = sshll.u32 %s137_s15, 4  ;;  %s57_s19 = sshll.u32 %s161_s1, 4  ;;  %s56_s16 = int_to_ptr.vmem [resolvable:$true] %s55_s16  ;;  %s58_s19 = int_to_ptr.hbm [resolvable:$true] %s57_s19 }
   0x9   :  { %28 = vadd.xlane.f32.xlu0 %v27_v2 }
   0xd   :  { %v80_v4 = vpop.eup %79 }
   0xe   :  { %v38_v5 = vmul.f32 2048.0, %v80_v4  ;;  %vm42_vm0 = vweird.f32 %v80_v4 }
  0x10   :  { %v39_v6 = vsub.f32 1.0, %v38_v5 }
  0x12   :  { %v40_v10 = vmul.f32 %v80_v4, %v39_v6 }
  0x14   :  { %v41_v13 = vadd.f32 %v80_v4, %v40_v10 }
  0x16   :  { %v43_v16 = vsel %vm42_vm0, %v80_v4, %v41_v13 }
  0x7c   :  { %v29_v7 = vpop.xlane.xlu0 %28 }
  0x7d   :  { %v30_v8 = vrot.slane %v29_v7, 4 }
  0x7f   :  { %v31_v9 = vadd.f32 %v30_v8, %v29_v7 }
  0x81   :  { %v32_v11 = vrot.slane %v31_v9, 2 }
  0x83   :  { %v33_v12 = vadd.f32 %v32_v11, %v31_v9 }
  0x85   :  { %v34_v14 = vrot.slane %v33_v12, 1 }
  0x87   :  { %v35_v15 = vadd.f32 %v34_v14, %v33_v12 }
  0x89   :  { %70 = vpush %v35_v15 }
  0x8a   :  { %72 = vpush %v43_v16 }
  0xba   :  { %s71_s0 = spop %70 }
  0xbb   :  { %s73_s13 = spop %72 }
  0xbc   :  { %s45_s14 = smul.f32 %s73_s13, %s71_s0 }
  0xbe   :  { %v46_v17 = vstv %s45_s14 }
  0xbf   :  { %v47_v18 = vsub.f32 %v25_v0, %v46_v17  ;;  %v48_v19 = vsub.f32 %v26_v1, %v46_v17 }
  0xc1   :  { %49 = vst [vmem:[#allocation5] sm:$0xff] %v47_v18 }
  0xc2   :  { %50 = vst [vmem:[#allocation5 + $0x8] sm:$0xff] %v48_v19 }
  0xc3   :  { %63 = dma.vmem_to_hbm [thread:$0]  %s56_s16, 256, %s58_s19, [#allocation4], %s134_s11, %s134_s11, %s135_s12  }
  0xc4   :  { %131 = dma.done.wait [#allocation4], 256  }
  0xc5   :  { %132 = vsyncadd [#allocation4], 4294967040 }
  0xc6   :  { %68 = vsyncpa [#allocation3], 1 }
  0xc7   :  { %69 = vsyncpa [#allocation4], 1 }

</bundles_post_ra>
